<compile_context>
chip_gen: v7x
topology: tpu7x:2x2x1
jax: 0.10.0
libtpu: 0.0.40
codegen_flags: <defaults>
</compile_context>

<pallas_src>
import jax
import jax.numpy as jnp
from jax.experimental import pallas as pl
from jax.experimental.pallas import tpu as pltpu


def _round_up(x: int, m: int) -> int:
    return (x + m - 1) // m * m


def _masked_bce_partial_sum_kernel(x_ref, t_ref, m_ref, out_ref):
    """One tile: masked BCE-with-logits sum over an [E, TN] lane-dense block."""
    # x_ref / t_ref: [E, TN]  (lanes = flattened batch*seq positions)
    # m_ref:         [1, TN]  float mask, broadcasts along the sublane (E) axis
    x = x_ref[...].astype(jnp.float32)
    t = t_ref[...].astype(jnp.float32)
    m = m_ref[...].astype(jnp.float32)          # computed once per tile, reused

    # Numerically stable BCE-with-logits (same formula PyTorch uses):
    #   max(x, 0) - x*t + log1p(exp(-|x|))
    loss = jnp.maximum(x, 0.0) - x * t + jnp.log1p(jnp.exp(-jnp.abs(x)))

    # Mask broadcast over sublanes; single f32 reduction for this tile.
    out_ref[0, 0] = jnp.sum(loss * m)


def masked_bce_with_logits_loss(logits, targets, mask, *, lane_block: int = 1024):
    """Scalar float32 loss matching MaskedBCEWithLogitsLoss.forward.

    logits / targets: [batch, sequence, element_size]
    mask:             [batch, sequence]  (nonzero == valid position)
    """
    B, S, E = logits.shape
    R = B * S

    # Lane-dense layout: flattened (batch*seq) axis on lanes.  reshape is free;
    # the transpose is layout plumbing and is cheap relative to the two
    # transcendentals/element the kernel evaluates.
    x = jnp.transpose(logits.reshape(R, E))           # [E, R]
    t = jnp.transpose(targets.reshape(R, E))          # [E, R]
    m = mask.reshape(1, R).astype(jnp.float32)        # [1, R], stays tiny

    # Tile width along the lane axis: multiple of 128, clamped to the problem.
    # Blocks are small (E * TN * 4B per buffer), so even deep pipelining fits
    # comfortably inside v7x's 64 MiB VMEM.
    TN = max(128, _round_up(min(lane_block, R), 128))
    Rp = _round_up(R, TN)
    if Rp != R:
        pad = Rp - R
        # Padded columns get mask == 0 so they contribute exactly 0 to the sum.
        x = jnp.pad(x, ((0, 0), (0, pad)))
        t = jnp.pad(t, ((0, 0), (0, pad)))
        m = jnp.pad(m, ((0, 0), (0, pad)))
    num_tiles = Rp // TN

    partials = pl.pallas_call(
        _masked_bce_partial_sum_kernel,
        out_shape=jax.ShapeDtypeStruct((num_tiles, 1), jnp.float32),
        grid=(num_tiles,),
        in_specs=[
            pl.BlockSpec((E, TN), lambda i: (0, i)),   # logits tile
            pl.BlockSpec((E, TN), lambda i: (0, i)),   # targets tile
            pl.BlockSpec((1, TN), lambda i: (0, i)),   # mask tile (row vector)
        ],
        # One scalar partial sum per tile; finalized in plain JAX below so the
        # grid axis carries no cross-iteration state and can run in parallel.
        out_specs=pl.BlockSpec((1, 1), lambda i: (i, 0),
                               memory_space=pltpu.MemorySpace.SMEM),
        compiler_params=pltpu.CompilerParams(
            dimension_semantics=("parallel",)),
    )(x, t, m)

    # Denominator in plain JAX (matches torch:
    #   mask.nonzero().numel() / len(mask.shape) * logits.shape[-1]).
    size = jnp.count_nonzero(mask).astype(jnp.float32) * jnp.float32(E)
    return jnp.sum(partials) / size


def _reference(logits, targets, mask):
    """Pure-JAX reference with the exact module semantics."""
    x = logits.astype(jnp.float32)
    t = targets.astype(jnp.float32)
    m = mask.astype(jnp.float32)
    loss = jnp.maximum(x, 0.0) - x * t + jnp.log1p(jnp.exp(-jnp.abs(x)))
    size = jnp.count_nonzero(mask).astype(jnp.float32) * x.shape[-1]
    return jnp.sum(loss * m[..., None]) / size


if __name__ == "__main__":
    # Case 1: small shape from the module's docstring layout ([B, S, E]).
    B, S, E = 2, 8, 32
    key = jax.random.PRNGKey(0)
    k_logits, k_targets, k_mask = jax.random.split(key, 3)

    logits = jax.random.normal(k_logits, (B, S, E), dtype=jnp.float32)
    targets = jax.random.bernoulli(k_targets, 0.5, (B, S, E)).astype(jnp.float32)
    mask = jax.random.bernoulli(k_mask, 0.7, (B, S)).astype(jnp.int32)
    mask = mask.at[0, 0].set(1)  # guarantee a nonzero denominator

    loss = jax.block_until_ready(masked_bce_with_logits_loss(logits, targets, mask))
    ref = _reference(logits, targets, mask)
    assert jnp.allclose(loss, ref, rtol=1e-4, atol=1e-6), (loss, ref)

    # Case 2: slightly larger shape with a small lane_block to exercise the
    # multi-tile ("parallel") grid path.
    B2, S2 = 4, 96
    kk = jax.random.split(jax.random.PRNGKey(1), 3)
    logits2 = jax.random.normal(kk[0], (B2, S2, E), dtype=jnp.float32)
    targets2 = jax.random.bernoulli(kk[1], 0.5, (B2, S2, E)).astype(jnp.float32)
    mask2 = jax.random.bernoulli(kk[2], 0.6, (B2, S2)).astype(jnp.int32)
    mask2 = mask2.at[0, 0].set(1)

    loss2 = jax.block_until_ready(
        masked_bce_with_logits_loss(logits2, targets2, mask2, lane_block=128))
    ref2 = _reference(logits2, targets2, mask2)
    assert jnp.allclose(loss2, ref2, rtol=1e-4, atol=1e-6), (loss2, ref2)

    print("KERNEL_OK")
</pallas_src>

<mosaic_0001>
module attributes {stable_mosaic.version = 11 : i64} {
  func.func @_masked_bce_partial_sum_kernel(%arg0: i32, %arg1: memref<32x128xf32, #tpu.memory_space<vmem>>, %arg2: memref<32x128xf32, #tpu.memory_space<vmem>>, %arg3: memref<1x128xf32, #tpu.memory_space<vmem>>, %arg4: memref<1x1xf32, #tpu.memory_space<smem>>) attributes {dimension_semantics = [#tpu.dimension_semantics<parallel>], iteration_bounds = array<i64: 1>, scalar_prefetch = 0 : i64, scratch_operands = 0 : i64, tpu.core_type = #tpu.core_type<tc>, window_params = [{transform_indices = @transform_0, window_bounds = array<i64: 32, 128>}, {transform_indices = @transform_1, window_bounds = array<i64: 32, 128>}, {transform_indices = @transform_2, window_bounds = array<i64: 1, 128>}, {transform_indices = @transform_3, window_bounds = array<i64: 1, 1>}]} {
    %c0 = arith.constant 0 : index
    %c0_0 = arith.constant 0 : index
    %0 = vector.load %arg1[%c0, %c0_0] : memref<32x128xf32, #tpu.memory_space<vmem>>, vector<32x128xf32>
    %c0_1 = arith.constant 0 : index
    %c0_2 = arith.constant 0 : index
    %1 = vector.load %arg2[%c0_1, %c0_2] : memref<32x128xf32, #tpu.memory_space<vmem>>, vector<32x128xf32>
    %c0_3 = arith.constant 0 : index
    %c0_4 = arith.constant 0 : index
    %2 = vector.load %arg3[%c0_3, %c0_4] : memref<1x128xf32, #tpu.memory_space<vmem>>, vector<1x128xf32>
    %cst = arith.constant 0.000000e+00 : f32
    %3 = vector.broadcast %cst : f32 to vector<32x128xf32>
    %4 = arith.maximumf %0, %3 : vector<32x128xf32>
    %5 = arith.mulf %0, %1 : vector<32x128xf32>
    %6 = arith.subf %4, %5 : vector<32x128xf32>
    %7 = math.absf %0 : vector<32x128xf32>
    %cst_5 = arith.constant 0.000000e+00 : f32
    %8 = vector.broadcast %cst_5 : f32 to vector<32x128xf32>
    %9 = arith.subf %8, %7 : vector<32x128xf32>
    %10 = math.exp %9 : vector<32x128xf32>
    %11 = math.log1p %10 : vector<32x128xf32>
    %12 = arith.addf %6, %11 : vector<32x128xf32>
    %13 = vector.broadcast %2 : vector<1x128xf32> to vector<32x128xf32>
    %14 = arith.mulf %12, %13 : vector<32x128xf32>
    %15 = vector.shape_cast %14 : vector<32x128xf32> to vector<1x32x128xf32>
    %cst_6 = arith.constant dense<0.000000e+00> : vector<1xf32>
    %16 = vector.multi_reduction <add>, %15, %cst_6 [1, 2] : vector<1x32x128xf32> to vector<1xf32>
    %17 = vector.shape_cast %16 : vector<1xf32> to vector<1x1x1xf32>
    %18 = vector.extract %17[0, 0, 0] : f32 from vector<1x1x1xf32>
    %c0_7 = arith.constant 0 : index
    %c0_8 = arith.constant 0 : index
    %19 = memref.load %arg4[%c0_7, %c0_8] : memref<1x1xf32, #tpu.memory_space<smem>>
    memref.store %18, %arg4[%c0_7, %c0_8] : memref<1x1xf32, #tpu.memory_space<smem>>
    return
  }
  func.func @transform_0(%arg0: i32) -> (i32, i32) {
    %c0_i32 = arith.constant 0 : i32
    %c0_i32_0 = arith.constant 0 : i32
    return %c0_i32, %arg0 : i32, i32
  }
  func.func @transform_1(%arg0: i32) -> (i32, i32) {
    %c0_i32 = arith.constant 0 : i32
    %c0_i32_0 = arith.constant 0 : i32
    return %c0_i32, %arg0 : i32, i32
  }
  func.func @transform_2(%arg0: i32) -> (i32, i32) {
    %c0_i32 = arith.constant 0 : i32
    %c0_i32_0 = arith.constant 0 : i32
    return %c0_i32, %arg0 : i32, i32
  }
  func.func @transform_3(%arg0: i32) -> (i32, i32) {
    %c0_i32 = arith.constant 0 : i32
    %c0_i32_0 = arith.constant 0 : i32
    return %arg0, %c0_i32 : i32, i32
  }
}

</mosaic_0001>

<bundles_post_ra>
// kernel: tpu_custom_call.1
= control target key start
LH: loop header
LB: loop body
LE: loop exit
PB: predicated region body
PF: predicated region fallthrough
CT: control target
= control target key end

     0   :  { %8 = vsyncpa [#allocation3], 0  ;;  %s329_s0 = inlined_call_operand.hbm [shape: f32[32,128], index: 0, kind: input, shape index: {}]   ;;  %s330_s1 = inlined_call_operand.hbm [shape: f32[32,128], index: 1, kind: input, shape index: {}]   ;;  %s331_s2 = inlined_call_operand.vmem [shape: f32[1,128], index: 2, kind: input, shape index: {}]   ;;  %s332_s3 = inlined_call_operand.hbm [shape: f32[1,1], index: 3, kind: output, shape index: {}]  }
   0x1   :  { %9 = vsyncpa [#allocation6], 0 }
   0x2   :  { %10 = vsyncpa [#allocation4], 0  ;;  %s243_s12 = smov [#allocation2]   ;;  %s183_s16 = scalar_lea.hbm %s329_s0, 512 }
   0x3   :  { %s16_s13 = sshll.u32 %s243_s12, 4  ;;  %p184_p0 = scmp.ne.s32.totalorder %s329_s0, %s183_s16  ;;  %s17_s13 = int_to_ptr.vmem [resolvable:$true] %s16_s13 }
   0x4   :  { %p187_p1 = scmp.lt.u32.totalorder %s183_s16, %s329_s0 }
   0x6   :  { %p189_p2 = pnand %p187_p1, %p184_p0 }
   0x8   :  { %192 = shalt.err (!%p189_p2)
}
   0x9   :  { %s193_s21 = scalar_lea.vmem %s17_s13, 512  ;;  %p198_p4 = scmp.lt.s32.totalorder %s17_s13, %s17_s13 }
   0xa   :  { %p194_p3 = scmp.ne.s32.totalorder %s17_s13, %s193_s21  ;;  %p199_p5 = scmp.lt.s32.totalorder %s193_s21, %s193_s21 }
   0xc   :  { %p200_p6 = por %p199_p5, %p198_p4 }
   0xe   :  { %p201_p7 = pnand %p200_p6, %p194_p3 }
  0x10   :  { %204 = shalt.err (!%p201_p7)
}
  0x11   :  { %s244_s22 = smov 128   ;;  %s245_s23 = smov 8  }
  0x12   :  { %22 = dma.hbm_to_vmem [thread:$0]  %s329_s0, 512, %s17_s13, [#allocation3], %s244_s22, %s244_s22, %s245_s23  }
  0x13   :  { %s246_s26 = smov [#allocation5]   ;;  %s205_s30 = scalar_lea.hbm %s330_s1, 512 }
  0x14   :  { %s28_s27 = sshll.u32 %s246_s26, 4  ;;  %p206_p8 = scmp.ne.s32.totalorder %s330_s1, %s205_s30  ;;  %s29_s27 = int_to_ptr.vmem [resolvable:$true] %s28_s27 }
  0x15   :  { %p209_p9 = scmp.lt.u32.totalorder %s205_s30, %s330_s1 }
  0x17   :  { %p211_p10 = pnand %p209_p9, %p206_p8 }
  0x19   :  { %214 = shalt.err (!%p211_p10)
}
  0x1a   :  { %s215_s8 = scalar_lea.vmem %s29_s27, 512  ;;  %p220_p12 = scmp.lt.s32.totalorder %s29_s27, %s29_s27 }
  0x1b   :  { %p216_p11 = scmp.ne.s32.totalorder %s29_s27, %s215_s8  ;;  %p221_p13 = scmp.lt.s32.totalorder %s215_s8, %s215_s8 }
  0x1d   :  { %p222_p0 = por %p221_p13, %p220_p12 }
  0x1f   :  { %p223_p1 = pnand %p222_p0, %p216_p11 }
  0x21   :  { %226 = shalt.err (!%p223_p1)
}
  0x22   :  { %34 = dma.hbm_to_vmem [thread:$0]  %s330_s1, 512, %s29_s27, [#allocation6], %s244_s22, %s244_s22, %s245_s23  }
  0x23   :  { %237 = dma.done.wait [#allocation3], 512  }
  0x24   :  { %238 = vsyncadd [#allocation3], 4294966784 }
  0x25   :  { %239 = dma.done.wait [#allocation6], 512  }
  0x26   :  { %240 = vsyncadd [#allocation6], 4294966784  ;;  %v43_v0 = vld [vmem:[#allocation2] sm:$0xff]  ;;  %v44_v1 = vld [vmem:[#allocation2 + $0x8] sm:$0xff]  ;;  %s227_s13 = scalar_lea.hbm %s332_s3, 16 }
  0x27   :  { %v292_v2 = vld [vmem:[#allocation2 + $0x10] sm:$0xff]  ;;  %v294_v3 = vld [vmem:[#allocation2 + $0x18] sm:$0xff]  ;;  %v64_v4 = vand.u32 2147483647, %v43_v0  ;;  %v65_v5 = vand.u32 2147483647, %v44_v1  ;;  %p228_p2 = scmp.ne.s32.totalorder %s332_s3, %s227_s13  ;;  %p231_p3 = scmp.lt.u32.totalorder %s227_s13, %s332_s3 }
  0x28   :  { %v66_v6 = vand.u32 2147483647, %v292_v2  ;;  %v67_v7 = vand.u32 2147483647, %v294_v3  ;;  %v47_v26 = vld [vmem:[#allocation5] sm:$0xff]  ;;  %v48_v28 = vld [vmem:[#allocation5 + $0x8] sm:$0xff] }
  0x29   :  { %v68_v8 = vsub.f32 0.0, %v64_v4  ;;  %v69_v9 = vsub.f32 0.0, %v65_v5  ;;  %v49_v29 = vld [vmem:[#allocation5 + $0x10] sm:$0xff]  ;;  %v50_v32 = vld [vmem:[#allocation5 + $0x18] sm:$0xff]  ;;  %v52_v33 = vmax.f32 %v43_v0, 0.0  ;;  %v56_v34 = vmul.f32 %v47_v26, %v43_v0  ;;  %p233_p4 = pnand %p231_p3, %p228_p2 }
  0x2a   :  { %v70_v10 = vsub.f32 0.0, %v66_v6  ;;  %v71_v11 = vsub.f32 0.0, %v67_v7  ;;  %v53_v37 = vmax.f32 %v44_v1, 0.0  ;;  %v57_v38 = vmul.f32 %v48_v28, %v44_v1  ;;  %v159_v61 = vld [vmem:[%s331_s2] ss:$0 sm:$0xff] }
  0x2b   :  { %v72_v12 = vmul.f32 1.442695, %v68_v8  ;;  %v74_v13 = vmul.f32 1.442695, %v69_v9  ;;  %v54_v41 = vmax.f32 %v292_v2, 0.0  ;;  %v58_v42 = vmul.f32 %v49_v29, %v292_v2 }
  0x2c   :  { %v76_v14 = vmul.f32 1.442695, %v70_v10  ;;  %v78_v15 = vmul.f32 1.442695, %v71_v11  ;;  %v55_v44 = vmax.f32 %v294_v3, 0.0  ;;  %v59_v45 = vmul.f32 %v50_v32, %v294_v3 }
  0x2d   :  { %167 = vpow2.f32 %v72_v12  ;;  %v60_v49 = vsub.f32 %v52_v33, %v56_v34  ;;  %v61_v54 = vsub.f32 %v53_v37, %v57_v38  ;;  %v62_v59 = vsub.f32 %v54_v41, %v58_v42 }
  0x2e   :  { %169 = vpow2.f32 %v74_v13  ;;  %v63_v2 = vsub.f32 %v55_v44, %v59_v45 }
  0x2f   :  { %171 = vpow2.f32 %v76_v14 }
  0x30   :  { %173 = vpow2.f32 %v78_v15 }
  0x37   :  { %v168_v16 = vpop.eup %167 }
  0x38   :  { %v170_v17 = vpop.eup %169  ;;  %v80_v18 = vadd.f32 1.0, %v168_v16  ;;  %v83_v23 = vmul.f32 -0.5, %v168_v16  ;;  %v86_v35 = vand.u32 2147483647, %v168_v16 }
  0x39   :  { %v172_v19 = vpop.eup %171  ;;  %v89_v20 = vadd.f32 1.0, %v170_v17  ;;  %v92_v24 = vmul.f32 -0.5, %v170_v17  ;;  %v95_v39 = vand.u32 2147483647, %v170_v17 }
  0x3a   :  { %v174_v21 = vpop.eup %173  ;;  %175 = vlog2.f32 %v80_v18  ;;  %v98_v22 = vadd.f32 1.0, %v172_v19  ;;  %v101_v27 = vmul.f32 -0.5, %v172_v19  ;;  %v84_v30 = vadd.f32 1.0, %v83_v23 }
  0x3b   :  { %177 = vlog2.f32 %v89_v20  ;;  %v107_v25 = vadd.f32 1.0, %v174_v21  ;;  %v110_v31 = vmul.f32 -0.5, %v174_v21  ;;  %v93_v36 = vadd.f32 1.0, %v92_v24 }
  0x3c   :  { %179 = vlog2.f32 %v98_v22  ;;  %v102_v40 = vadd.f32 1.0, %v101_v27  ;;  %v104_v43 = vand.u32 2147483647, %v172_v19  ;;  %v85_v46 = vmul.f32 %v168_v16, %v84_v30 }
  0x3d   :  { %181 = vlog2.f32 %v107_v25  ;;  %v111_v47 = vadd.f32 1.0, %v110_v31  ;;  %vm302_vm0 = vcmp.lt.f32.partialorder %v86_v35, 0.0004427343  ;;  %v94_v51 = vmul.f32 %v170_v17, %v93_v36 }
  0x3e   :  { %v113_v52 = vand.u32 2147483647, %v174_v21  ;;  %vm306_vm1 = vcmp.lt.f32.partialorder %v95_v39, 0.0004427343  ;;  %v103_v57 = vmul.f32 %v172_v19, %v102_v40  ;;  %vm105_vm2 = vcmp.lt.f32.partialorder %v104_v43, 0.0004427343 }
  0x3f   :  { %v112_v0 = vmul.f32 %v174_v21, %v111_v47 }
  0x40   :  { %vm114_vm3 = vcmp.lt.f32.partialorder %v113_v52, 0.0004427343 }
  0x44   :  { %v176_v48 = vpop.eup %175 }
  0x45   :  { %v178_v53 = vpop.eup %177  ;;  %v82_v55 = vmul.f32 0.6931472, %v176_v48 }
  0x46   :  { %v180_v58 = vpop.eup %179  ;;  %v91_v60 = vmul.f32 0.6931472, %v178_v53 }
  0x47   :  { %v88_v62 = vsel %vm302_vm0, %v85_v46, %v82_v55  ;;  %v100_v63 = vmul.f32 0.6931472, %v180_v58  ;;  %v182_v1 = vpop.eup %181 }
  0x48   :  { %v97_v3 = vsel %vm306_vm1, %v94_v51, %v91_v60  ;;  %v116_v4 = vadd.f32 %v88_v62, %v60_v49  ;;  %v109_v6 = vmul.f32 0.6931472, %v182_v1 }
  0x49   :  { %v106_v5 = vsel %vm105_vm2, %v103_v57, %v100_v63  ;;  %v117_v7 = vadd.f32 %v97_v3, %v61_v54 }
  0x4a   :  { %v118_v8 = vadd.f32 %v106_v5, %v62_v59  ;;  %v126_v9 = vmul.f32 %v159_v61, %v116_v4  ;;  %v115_v10 = vsel %vm114_vm3, %v112_v0, %v109_v6 }
  0x4b   :  { %v127_v11 = vmul.f32 %v159_v61, %v117_v7  ;;  %v119_v12 = vadd.f32 %v115_v10, %v63_v2 }
  0x4c   :  { %v128_v13 = vmul.f32 %v159_v61, %v118_v8 }
  0x4d   :  { %v130_v14 = vadd.f32 %v127_v11, %v126_v9  ;;  %v129_v15 = vmul.f32 %v159_v61, %v119_v12 }
  0x4f   :  { %v131_v16 = vadd.f32 %v130_v14, %v128_v13 }
  0x51   :  { %v132_v17 = vadd.f32 %v131_v16, %v129_v15 }
  0x53   :  { %133 = vadd.xlane.f32.xlu0 %v132_v17 }
  0xe0   :  { %v134_v18 = vpop.xlane.xlu0 %133 }
  0xe1   :  { %v135_v19 = vrot.slane %v134_v18, 4 }
  0xe3   :  { %v136_v20 = vadd.f32 %v135_v19, %v134_v18 }
  0xe5   :  { %v137_v21 = vrot.slane %v136_v20, 2 }
  0xe7   :  { %v138_v22 = vadd.f32 %v137_v21, %v136_v20 }
  0xe9   :  { %v139_v23 = vrot.slane %v138_v22, 1 }
  0xeb   :  { %v140_v24 = vadd.f32 %v139_v23, %v138_v22 }
  0xed   :  { %160 = vpush %v140_v24 }
 0x11e   :  { %s161_s2 = spop %160 }
 0x11f   :  { %143 = sst [smem:[#allocation7]] %s161_s2 }
 0x120   :  { %236 = shalt.err (!%p233_p4)
}
 0x121   :  { %s247_s18 = smov [#allocation7]  }
 0x122   :  { %151 = dma.smem_to_hbm %s247_s18, 16, %s332_s3, [#allocation4]  }
 0x123   :  { %241 = dma.done.wait [#allocation4], 16  }
 0x124   :  { %242 = vsyncadd [#allocation4], 4294967280 }
 0x125   :  { %155 = sfence }
 0x126   :  { %156 = vsyncpa [#allocation3], 1 }
 0x127   :  { %157 = vsyncpa [#allocation6], 1 }
 0x128   :  { %158 = vsyncpa [#allocation4], 1 }

</bundles_post_ra>
